<compile_context>
chip_gen: v7x
topology: tpu7x:2x2x1
jax: 0.10.0
libtpu: 0.0.40
codegen_flags: <defaults>
</compile_context>

<pallas_src>
import functools
import math

import jax
import jax.numpy as jnp
from jax.experimental import pallas as pl
from jax.experimental.pallas import tpu as pltpu


# 48 MiB is safe on v7x (64 MiB physical) and above the 32 MiB default everywhere;
# raise toward ~96 MiB on v5e/v6e to allow larger block_n.
_DEFAULT_VMEM_LIMIT = 48 * 1024 * 1024


def _layer_norm(x, gamma, beta, eps):
    mu = jnp.mean(x, axis=-1, keepdims=True)
    var = jnp.mean((x - mu) ** 2, axis=-1, keepdims=True)
    return (x - mu) * jax.lax.rsqrt(var + eps) * gamma + beta


# ---------------------------------------------------------------------------
# Phase 1: context accumulation over sequence tiles (deferred k-normalization)
# ---------------------------------------------------------------------------
def _ctx_kernel(x_ref, wkv_ref, bkv_ref, mask_ref, ctx_ref,
                ctx_acc, m_acc, z_acc,
                *, num_groups, group_width, compute_dtype, apply_mask):
    nt = pl.program_id(1)
    x = x_ref[...]                                  # (Nt, D) f32
    D = x.shape[-1]
    cd = compute_dtype

    @pl.when(nt == 0)
    def _():
        m_acc[...] = jnp.full_like(m_acc, -jnp.inf)
        z_acc[...] = jnp.zeros_like(z_acc)
        ctx_acc[...] = jnp.zeros_like(ctx_acc)

    # Fused k|v projection: one wide GEMM against the packed (D, 2D) weight slab.
    kv = jnp.dot(x.astype(cd), wkv_ref[...],
                 preferred_element_type=jnp.float32) + bkv_ref[...]
    k_hat = kv[:, :D]
    v = kv[:, D:]

    # Deferred softmax over the sequence axis: running max / denom / numerator.
    m_old = m_acc[...]                                              # (1, D)
    m_new = jnp.maximum(m_old, jnp.max(k_hat, axis=0, keepdims=True))
    alpha = jnp.exp(m_old - m_new)                                  # (1, D)
    p = jnp.exp(k_hat - m_new)                                      # (Nt, D)
    z_acc[...] = alpha * z_acc[...] + jnp.sum(p, axis=0, keepdims=True)
    m_acc[...] = m_new

    p_c = p.astype(cd)
    v_c = v.astype(cd)
    for g in range(num_groups):                                     # static, small
        sl = slice(g * group_width, (g + 1) * group_width)
        # ctxT[e, d] += sum_n v[n, e] * p[n, d]  (stored transposed so the
        # per-d rescales / normalization below are pure lane broadcasts).
        ctx_t = jax.lax.dot_general(
            v_c[:, sl], p_c[:, sl], (((0,), (0,)), ((), ())),
            preferred_element_type=jnp.float32)                      # (gw, gw)
        ctx_acc[g] = alpha[:, sl] * ctx_acc[g] + ctx_t

    @pl.when(nt == pl.num_programs(1) - 1)
    def _():
        inv_z = 1.0 / z_acc[...]                                     # (1, D)
        for g in range(num_groups):
            sl = slice(g * group_width, (g + 1) * group_width)
            ctx_g = ctx_acc[g] * inv_z[:, sl]
            if apply_mask:                       # block-diagonal within a group
                ctx_g = ctx_g * mask_ref[...]
            ctx_ref[g] = ctx_g


# ---------------------------------------------------------------------------
# Phase 2: stream N-tiles through q-softmax, q@ctx, Wo, LN1, FFN, LN2
# ---------------------------------------------------------------------------
def _attn_ffn_kernel(x_ref, ctx_ref, wq_ref, bq_ref, wo_ref, bo_ref,
                     g1_ref, be1_ref, w1_ref, b1_ref, w2_ref, b2_ref,
                     g2_ref, be2_ref, o_ref,
                     *, nhead, num_groups, group_width, eps, compute_dtype):
    x = x_ref[...]                                  # (Nt, D) f32 residual path
    Nt, D = x.shape
    dk = D // nhead
    scale = 1.0 / math.sqrt(dk)
    cd = compute_dtype

    # q projection + per-head softmax over d_k, scaled by 1/sqrt(d_k).
    q_hat = jnp.dot(x.astype(cd), wq_ref[...],
                    preferred_element_type=jnp.float32) + bq_ref[...]
    # TODO(synk): when dk < 128 this (Nt, H, dk) view pads lanes; a segmented
    # lane reduction in the (Nt, D) layout would avoid the relayout.
    qh = q_hat.reshape(Nt, nhead, dk)
    qh = qh - jnp.max(qh, axis=-1, keepdims=True)
    qe = jnp.exp(qh)
    q = (qe / jnp.sum(qe, axis=-1, keepdims=True)) * scale
    q = q.reshape(Nt, D).astype(cd)

    # Linear attention: out[n, e] = sum_d q[n, d] * ctx[d, e], per head group
    # (ctx stored transposed, so this is the classic A @ B.T MXU pattern).
    parts = []
    for g in range(num_groups):                     # static, small
        sl = slice(g * group_width, (g + 1) * group_width)
        parts.append(jax.lax.dot_general(
            q[:, sl], ctx_ref[g].astype(cd), (((1,), (1,)), ((), ())),
            preferred_element_type=jnp.float32))    # (Nt, gw)
    attn = parts[0] if num_groups == 1 else jnp.concatenate(parts, axis=-1)

    # Output projection + residual + LayerNorm1 (residuals / LN stay f32).
    x1 = jnp.dot(attn.astype(cd), wo_ref[...],
                 preferred_element_type=jnp.float32) + bo_ref[...]
    xa = _layer_norm(x + x1, g1_ref[...], be1_ref[...], eps)

    # Feed-forward: linear1 -> GeLU -> linear2.
    h1 = jnp.dot(xa.astype(cd), w1_ref[...],
                 preferred_element_type=jnp.float32) + b1_ref[...]
    h1 = jax.nn.gelu(h1, approximate=True)
    x2 = jnp.dot(h1.astype(cd), w2_ref[...],
                 preferred_element_type=jnp.float32) + b2_ref[...]

    # Residual + LayerNorm2, lane-contiguous store.
    o_ref[...] = _layer_norm(xa + x2, g2_ref[...], be2_ref[...], eps)


# ---------------------------------------------------------------------------
# Builders (cached) + narrow single-buffering capability probe
# ---------------------------------------------------------------------------
@functools.lru_cache(maxsize=None)
def _weight_single_buffering_supported():
    """One-time narrow capability probe for pl.Buffered(1) on constant blocks.

    Keeps the real kernel builds out of any try/except so genuine errors surface.
    """
    try:
        mode = pl.Buffered(1)

        def k(a_ref, o_ref):
            o_ref[...] = a_ref[...] * 2.0

        f = pl.pallas_call(
            k,
            out_shape=jax.ShapeDtypeStruct((8, 128), jnp.float32),
            grid_spec=pltpu.PrefetchScalarGridSpec(
                num_scalar_prefetch=0,
                grid=(2,),
                in_specs=[pl.BlockSpec((8, 128), lambda i: (0, 0),
                                       pipeline_mode=mode)],
                out_specs=pl.BlockSpec((8, 128), lambda i: (0, 0)),
            ),
        )
        jax.block_until_ready(f(jnp.ones((8, 128), jnp.float32)))
        return True
    except Exception:
        # pl.Buffered(1) unsupported on this JAX version; use default buffering.
        return False


def _const_spec(shape):
    """BlockSpec for grid-invariant (weight) blocks; single-buffered if supported."""
    rank = len(shape)
    index_map = lambda b, n: (0,) * rank
    if _weight_single_buffering_supported():
        return pl.BlockSpec(shape, index_map, pipeline_mode=pl.Buffered(1))
    return pl.BlockSpec(shape, index_map)


@functools.lru_cache(maxsize=None)
def _build_ctx_call(B, N, D, nhead, group_size, block_n, cd_name, vmem_limit):
    cd = jnp.dtype(cd_name)
    dk = D // nhead
    gw = group_size * dk
    G = nhead // group_size
    kernel = functools.partial(
        _ctx_kernel, num_groups=G, group_width=gw, compute_dtype=cd,
        apply_mask=group_size > 1)
    cost = pl.CostEstimate(
        flops=int(2 * B * N * D * (2 * D + gw)),
        transcendentals=int(B * N * D),
        bytes_accessed=int(4 * B * N * D + D * 2 * D * cd.itemsize
                           + 4 * B * G * gw * gw))
    return pl.pallas_call(
        kernel,
        out_shape=jax.ShapeDtypeStruct((B, G, gw, gw), jnp.float32),
        grid_spec=pltpu.PrefetchScalarGridSpec(
            num_scalar_prefetch=0,
            grid=(B, N // block_n),
            in_specs=[
                pl.BlockSpec((None, block_n, D), lambda b, n: (b, n, 0)),
                _const_spec((D, 2 * D)),        # packed Wk|Wv
                _const_spec((1, 2 * D)),        # packed bk|bv
                _const_spec((gw, gw)),          # within-group head mask
            ],
            out_specs=pl.BlockSpec((None, G, gw, gw), lambda b, n: (b, 0, 0, 0)),
            scratch_shapes=[
                pltpu.VMEM((G, gw, gw), jnp.float32),   # un-normalized ctx^T
                pltpu.VMEM((1, D), jnp.float32),        # running max
                pltpu.VMEM((1, D), jnp.float32),        # running denom
            ],
        ),
        compiler_params=pltpu.CompilerParams(
            dimension_semantics=("parallel", "arbitrary"),
            vmem_limit_bytes=vmem_limit),
        cost_estimate=cost,
    )


@functools.lru_cache(maxsize=None)
def _build_attn_ffn_call(B, N, D, F, nhead, group_size, block_n, cd_name,
                         eps, vmem_limit):
    cd = jnp.dtype(cd_name)
    dk = D // nhead
    gw = group_size * dk
    G = nhead // group_size
    kernel = functools.partial(
        _attn_ffn_kernel, nhead=nhead, num_groups=G, group_width=gw,
        eps=eps, compute_dtype=cd)
    cost = pl.CostEstimate(
        flops=int(2 * B * N * (2 * D * D + D * gw + 2 * D * F)),
        transcendentals=int(B * N * (D + F)),
        bytes_accessed=int(8 * B * N * D
                           + (2 * D * D + 2 * D * F) * cd.itemsize
                           + 4 * B * G * gw * gw))
    w_specs = [
        _const_spec((D, D)), _const_spec((1, D)),     # wq, bq
        _const_spec((D, D)), _const_spec((1, D)),     # wo, bo
        _const_spec((1, D)), _const_spec((1, D)),     # LN1 gamma, beta
        _const_spec((D, F)), _const_spec((1, F)),     # w1, b1
        _const_spec((F, D)), _const_spec((1, D)),     # w2, b2
        _const_spec((1, D)), _const_spec((1, D)),     # LN2 gamma, beta
    ]
    return pl.pallas_call(
        kernel,
        out_shape=jax.ShapeDtypeStruct((B, N, D), jnp.float32),
        grid_spec=pltpu.PrefetchScalarGridSpec(
            num_scalar_prefetch=0,
            grid=(B, N // block_n),
            in_specs=[
                pl.BlockSpec((None, block_n, D), lambda b, n: (b, n, 0)),
                pl.BlockSpec((None, G, gw, gw), lambda b, n: (b, 0, 0, 0)),
            ] + w_specs,
            out_specs=pl.BlockSpec((None, block_n, D), lambda b, n: (b, n, 0)),
        ),
        compiler_params=pltpu.CompilerParams(
            dimension_semantics=("parallel", "parallel"),
            vmem_limit_bytes=vmem_limit),
        cost_estimate=cost,
    )


# ---------------------------------------------------------------------------
# Host-side wrappers
# ---------------------------------------------------------------------------
def prepare_params(params, *, nhead, compute_dtype=jnp.float32, mxu_width=256):
    """One-time weight packing / casting (hoisted out of the per-call hot path).

    mxu_width: target contraction width for the head-grouped attention GEMMs.
      256 matches the v6e/v7x MXU; use 128 on v5e; values <= d_k give the pure
      per-head path (no block-diagonal mask applied at all).
    """
    D = params["wq"].shape[0]
    assert D % nhead == 0, "d_model must be divisible by nhead"
    dk = D // nhead
    group_size = 1
    for g in range(1, nhead + 1):
        if nhead % g == 0 and g * dk <= mxu_width:
            group_size = g
    gw = group_size * dk

    cd = jnp.dtype(compute_dtype)
    w = lambda a: jnp.asarray(a, cd)               # matmul weights in compute dtype
    f32 = lambda a: jnp.asarray(a, jnp.float32)

    # Within-group block-diagonal head mask (all-ones and unused if group_size==1).
    ids = jnp.arange(gw, dtype=jnp.int32) // dk
    mask = (ids[:, None] == ids[None, :]).astype(jnp.float32)

    return {
        "nhead": nhead,
        "group_size": group_size,
        "compute_dtype": cd.name,
        "wkv": w(jnp.concatenate([params["wk"], params["wv"]], axis=1)),
        "bkv": f32(jnp.concatenate([params["bk"], params["bv"]], axis=1)),
        "mask": mask,
        "wq": w(params["wq"]), "bq": f32(params["bq"]),
        "wo": w(params["wo"]), "bo": f32(params["bo"]),
        "g1": f32(params["g1"]), "be1": f32(params["be1"]),
        "w1": w(params["w1"]), "b1": f32(params["b1"]),
        "w2": w(params["w2"]), "b2": f32(params["b2"]),
        "g2": f32(params["g2"]), "be2": f32(params["be2"]),
    }


def _pick_block_n(N):
    # Largest multiple-of-8 divisor of N (capped to bound VMEM); full N otherwise.
    best = None
    for c in range(8, min(N, 512) + 1, 8):
        if N % c == 0:
            best = c
    return best if best is not None else N


def self_attention_layer(x, prep, *, block_n=None, eps=1e-6,
                         vmem_limit_bytes=_DEFAULT_VMEM_LIMIT):
    """SelfAttentionLayer forward (eval mode: dropouts identity, src_mask=None)."""
    B, N, D = x.shape
    nhead = prep["nhead"]
    group_size = prep["group_size"]
    F = prep["w1"].shape[-1]
    assert D % nhead == 0, "d_model must be divisible by nhead"
    if block_n is None:
        block_n = _pick_block_n(N)
    assert N % block_n == 0 and (block_n % 8 == 0 or block_n == N), \
        "block_n must divide N and be a multiple of 8 (or equal N)"

    x = x.astype(jnp.float32)

    ctx_call = _build_ctx_call(B, N, D, nhead, group_size, block_n,
                               prep["compute_dtype"], vmem_limit_bytes)
    ctx = ctx_call(x, prep["wkv"], prep["bkv"], prep["mask"])

    ffn_call = _build_attn_ffn_call(B, N, D, F, nhead, group_size, block_n,
                                    prep["compute_dtype"], float(eps),
                                    vmem_limit_bytes)
    return ffn_call(x, ctx, prep["wq"], prep["bq"], prep["wo"], prep["bo"],
                    prep["g1"], prep["be1"], prep["w1"], prep["b1"],
                    prep["w2"], prep["b2"], prep["g2"], prep["be2"])


# ---------------------------------------------------------------------------
# Plain-JAX reference mirroring the PyTorch module (eval mode, f32)
# ---------------------------------------------------------------------------
def reference_forward(x, p, *, nhead, eps=1e-6):
    B, N, D = x.shape
    dk = D // nhead

    def proj(z, w, b):
        return z @ w + b

    q = proj(x, p["wq"], p["bq"]).reshape(B, N, nhead, dk).transpose(0, 2, 1, 3)
    k = proj(x, p["wk"], p["bk"]).reshape(B, N, nhead, dk).transpose(0, 2, 1, 3)
    v = proj(x, p["wv"], p["bv"]).reshape(B, N, nhead, dk).transpose(0, 2, 1, 3)

    q = jax.nn.softmax(q, axis=-1) / math.sqrt(dk)
    k = jax.nn.softmax(k, axis=-2)
    ctx = jnp.einsum("bhnd,bhne->bhde", k, v)
    out = jnp.einsum("bhnd,bhde->bhne", q, ctx)
    out = out.transpose(0, 2, 1, 3).reshape(B, N, D)
    x1 = proj(out, p["wo"], p["bo"])

    def ln(z, g, b):
        mu = jnp.mean(z, axis=-1, keepdims=True)
        var = jnp.mean((z - mu) ** 2, axis=-1, keepdims=True)
        return (z - mu) / jnp.sqrt(var + eps) * g + b

    xa = ln(x + x1, p["g1"], p["be1"])
    h1 = jax.nn.gelu(proj(xa, p["w1"], p["b1"]), approximate=True)
    x2 = proj(h1, p["w2"], p["b2"])
    return ln(xa + x2, p["g2"], p["be2"])


def init_params(key, d_model, dim_feedforward):
    keys = jax.random.split(key, 8)
    s = 0.02
    D, F = d_model, dim_feedforward
    return {
        "wq": s * jax.random.normal(keys[0], (D, D), jnp.float32),
        "bq": s * jax.random.normal(keys[1], (1, D), jnp.float32),
        "wk": s * jax.random.normal(keys[2], (D, D), jnp.float32),
        "bk": jnp.zeros((1, D), jnp.float32),
        "wv": s * jax.random.normal(keys[3], (D, D), jnp.float32),
        "bv": jnp.zeros((1, D), jnp.float32),
        "wo": s * jax.random.normal(keys[4], (D, D), jnp.float32),
        "bo": jnp.zeros((1, D), jnp.float32),
        "g1": jnp.ones((1, D), jnp.float32),
        "be1": jnp.zeros((1, D), jnp.float32),
        "w1": s * jax.random.normal(keys[5], (D, F), jnp.float32),
        "b1": s * jax.random.normal(keys[6], (1, F), jnp.float32),
        "w2": s * jax.random.normal(keys[7], (F, D), jnp.float32),
        "b2": jnp.zeros((1, D), jnp.float32),
        "g2": jnp.ones((1, D), jnp.float32),
        "be2": jnp.zeros((1, D), jnp.float32),
    }


if __name__ == "__main__":
    B, N, D, H, F = 2, 16, 32, 4, 64   # batch, seq, d_model, nhead, dim_feedforward

    key = jax.random.PRNGKey(0)
    kx, kp = jax.random.split(key)
    x = jax.random.normal(kx, (B, N, D), jnp.float32)
    params = init_params(kp, D, F)

    ref = reference_forward(x, params, nhead=H)

    # f32 matmul path, head-grouped contraction (4 heads -> 32-wide group) with
    # sequence tiling (2 N-tiles of 8) and deferred k-normalization.
    prep32 = prepare_params(params, nhead=H, compute_dtype=jnp.float32,
                            mxu_width=256)
    out32 = jax.block_until_ready(
        self_attention_layer(x, prep32, block_n=8))
    assert out32.shape == (B, N, D)
    assert jnp.allclose(out32, ref, rtol=1e-4, atol=1e-4), "f32 mismatch vs reference"

    # bf16 matmul path (f32 accumulate / softmax / LayerNorm) with the pure
    # per-head contraction (group_size=1, no block-diagonal mask).
    prep16 = prepare_params(params, nhead=H, compute_dtype=jnp.bfloat16,
                            mxu_width=8)
    out16 = jax.block_until_ready(
        self_attention_layer(x, prep16, block_n=8))
    assert jnp.allclose(out16, ref, rtol=5e-2, atol=5e-2), "bf16 mismatch vs reference"

    print("KERNEL_OK")
</pallas_src>

<mosaic_0001>
module attributes {stable_mosaic.version = 11 : i64} {
  func.func @k(%arg0: i32, %arg1: memref<8x128xf32, #tpu.memory_space<vmem>>, %arg2: memref<8x128xf32, #tpu.memory_space<vmem>>) attributes {dimension_semantics = [#tpu.dimension_semantics<arbitrary>], iteration_bounds = array<i64: 2>, scalar_prefetch = 0 : i64, scratch_operands = 0 : i64, tpu.core_type = #tpu.core_type<tc>, window_params = [{pipeline_mode = #tpu.pipeline_mode<synchronous>, transform_indices = @transform_0, window_bounds = array<i64: 8, 128>}, {pipeline_mode = #tpu.pipeline_mode<synchronous>, transform_indices = @transform_1, window_bounds = array<i64: 8, 128>}]} {
    %c0 = arith.constant 0 : index
    %c0_0 = arith.constant 0 : index
    %0 = vector.load %arg1[%c0, %c0_0] : memref<8x128xf32, #tpu.memory_space<vmem>>, vector<8x128xf32>
    %cst = arith.constant 2.000000e+00 : f32
    %1 = vector.broadcast %cst : f32 to vector<8x128xf32>
    %2 = arith.mulf %0, %1 : vector<8x128xf32>
    %c0_1 = arith.constant 0 : index
    %c0_2 = arith.constant 0 : index
    %3 = vector.load %arg2[%c0_1, %c0_2] : memref<8x128xf32, #tpu.memory_space<vmem>>, vector<8x128xf32>
    tpu.vector_store %arg2[%c0_1, %c0_2], %2 {strides = array<i32>} : memref<8x128xf32, #tpu.memory_space<vmem>>, vector<8x128xf32>,
    return
  }
  func.func @transform_0(%arg0: i32) -> (i32, i32) {
    %c0_i32 = arith.constant 0 : i32
    %c0_i32_0 = arith.constant 0 : i32
    %c0_i32_1 = arith.constant 0 : i32
    return %c0_i32, %c0_i32_0 : i32, i32
  }
  func.func @transform_1(%arg0: i32) -> (i32, i32) {
    %c0_i32 = arith.constant 0 : i32
    %c0_i32_0 = arith.constant 0 : i32
    %c0_i32_1 = arith.constant 0 : i32
    return %c0_i32, %c0_i32_0 : i32, i32
  }
}

module attributes {stable_mosaic.version = 11 : i64} {
  func.func @_ctx_kernel(%arg0: i32, %arg1: i32, %arg2: memref<1x8x32xf32, #tpu.memory_space<vmem>>, %arg3: memref<32x64xf32, #tpu.memory_space<vmem>>, %arg4: memref<1x64xf32, #tpu.memory_space<vmem>>, %arg5: memref<32x32xf32, #tpu.memory_space<vmem>>, %arg6: memref<1x1x32x32xf32, #tpu.memory_space<vmem>>, %arg7: memref<1x32x32xf32, #tpu.memory_space<vmem>>, %arg8: memref<1x32xf32, #tpu.memory_space<vmem>>, %arg9: memref<1x32xf32, #tpu.memory_space<vmem>>) attributes {dimension_semantics = [#tpu.dimension_semantics<parallel>, #tpu.dimension_semantics<arbitrary>], iteration_bounds = array<i64: 2, 2>, scalar_prefetch = 0 : i64, scratch_operands = 3 : i64, tpu.core_type = #tpu.core_type<tc>, window_params = [{transform_indices = @transform_0, window_bounds = array<i64: 1, 8, 32>}, {pipeline_mode = #tpu.pipeline_mode<synchronous>, transform_indices = @transform_1, window_bounds = array<i64: 32, 64>}, {pipeline_mode = #tpu.pipeline_mode<synchronous>, transform_indices = @transform_2, window_bounds = array<i64: 1, 64>}, {pipeline_mode = #tpu.pipeline_mode<synchronous>, transform_indices = @transform_3, window_bounds = array<i64: 32, 32>}, {transform_indices = @transform_4, window_bounds = array<i64: 1, 1, 32, 32>}]} {
    %c0 = arith.constant 0 : index
    %c0_0 = arith.constant 0 : index
    %c0_1 = arith.constant 0 : index
    %0 = vector.load %arg2[%c0, %c0_0, %c0_1] : memref<1x8x32xf32, #tpu.memory_space<vmem>>, vector<1x8x32xf32>
    %1 = vector.shape_cast %0 : vector<1x8x32xf32> to vector<8x32xf32>
    %c0_i32 = arith.constant 0 : i32
    %2 = arith.cmpi eq, %arg1, %c0_i32 : i32
    %3 = arith.extui %2 : i1 to i32
    %c0_i32_2 = arith.constant 0 : i32
    %4 = arith.cmpi ne, %3, %c0_i32_2 : i32
    scf.if %4 {
      %cst_25 = arith.constant 0xFF800000 : f32
      %40 = vector.broadcast %cst_25 : f32 to vector<1x32xf32>
      %c0_26 = arith.constant 0 : index
      %c0_27 = arith.constant 0 : index
      %41 = vector.load %arg8[%c0_26, %c0_27] : memref<1x32xf32, #tpu.memory_space<vmem>>, vector<1x32xf32>
      tpu.vector_store %arg8[%c0_26, %c0_27], %40 {strides = array<i32>} : memref<1x32xf32, #tpu.memory_space<vmem>>, vector<1x32xf32>,
      %cst_28 = arith.constant 0.000000e+00 : f32
      %42 = vector.broadcast %cst_28 : f32 to vector<1x32xf32>
      %c0_29 = arith.constant 0 : index
      %c0_30 = arith.constant 0 : index
      %43 = vector.load %arg9[%c0_29, %c0_30] : memref<1x32xf32, #tpu.memory_space<vmem>>, vector<1x32xf32>
      tpu.vector_store %arg9[%c0_29, %c0_30], %42 {strides = array<i32>} : memref<1x32xf32, #tpu.memory_space<vmem>>, vector<1x32xf32>,
      %cst_31 = arith.constant 0.000000e+00 : f32
      %44 = vector.broadcast %cst_31 : f32 to vector<1x32x32xf32>
      %c0_32 = arith.constant 0 : index
      %c0_33 = arith.constant 0 : index
      %c0_34 = arith.constant 0 : index
      %45 = vector.load %arg7[%c0_32, %c0_33, %c0_34] : memref<1x32x32xf32, #tpu.memory_space<vmem>>, vector<1x32x32xf32>
      tpu.vector_store %arg7[%c0_32, %c0_33, %c0_34], %44 {strides = array<i32>} : memref<1x32x32xf32, #tpu.memory_space<vmem>>, vector<1x32x32xf32>,
    } else {
    }
    %c0_3 = arith.constant 0 : index
    %c0_4 = arith.constant 0 : index
    %5 = vector.load %arg3[%c0_3, %c0_4] : memref<32x64xf32, #tpu.memory_space<vmem>>, vector<32x64xf32>
    %cst = arith.constant dense<0.000000e+00> : vector<8x64xf32>
    %6 = tpu.matmul %1, %5, %cst {dimension_numbers = #tpu.dot_dimension_numbers<[1], [0], [0], [1], [0, 0, 1, 1], [], []>} : vector<8x32xf32>, vector<32x64xf32>, vector<8x64xf32> -> vector<8x64xf32>
    %c0_5 = arith.constant 0 : index
    %c0_6 = arith.constant 0 : index
    %7 = vector.load %arg4[%c0_5, %c0_6] : memref<1x64xf32, #tpu.memory_space<vmem>>, vector<1x64xf32>
    %8 = vector.broadcast %7 : vector<1x64xf32> to vector<8x64xf32>
    %9 = arith.addf %6, %8 : vector<8x64xf32>
    %10 = vector.extract_strided_slice %9 {offsets = [0, 0], sizes = [8, 32], strides = [1, 1]} : vector<8x64xf32> to vector<8x32xf32>
    %11 = vector.extract_strided_slice %9 {offsets = [0, 32], sizes = [8, 32], strides = [1, 1]} : vector<8x64xf32> to vector<8x32xf32>
    %c0_7 = arith.constant 0 : index
    %c0_8 = arith.constant 0 : index
    %12 = vector.load %arg8[%c0_7, %c0_8] : memref<1x32xf32, #tpu.memory_space<vmem>>, vector<1x32xf32>
    %cst_9 = arith.constant dense<0xFF800000> : vector<32xf32>
    %13 = vector.multi_reduction <maximumf>, %10, %cst_9 [0] : vector<8x32xf32> to vector<32xf32>
    %14 = vector.shape_cast %13 : vector<32xf32> to vector<1x32xf32>
    %15 = arith.maximumf %12, %14 : vector<1x32xf32>
    %16 = arith.subf %12, %15 : vector<1x32xf32>
    %17 = math.exp %16 : vector<1x32xf32>
    %18 = vector.broadcast %15 : vector<1x32xf32> to vector<8x32xf32>
    %19 = arith.subf %10, %18 : vector<8x32xf32>
    %20 = math.exp %19 : vector<8x32xf32>
    %c0_10 = arith.constant 0 : index
    %c0_11 = arith.constant 0 : index
    %21 = vector.load %arg9[%c0_10, %c0_11] : memref<1x32xf32, #tpu.memory_space<vmem>>, vector<1x32xf32>
    %22 = arith.mulf %17, %21 : vector<1x32xf32>
    %cst_12 = arith.constant dense<0.000000e+00> : vector<32xf32>
    %23 = vector.multi_reduction <add>, %20, %cst_12 [0] : vector<8x32xf32> to vector<32xf32>
    %24 = vector.shape_cast %23 : vector<32xf32> to vector<1x32xf32>
    %25 = arith.addf %22, %24 : vector<1x32xf32>
    %c0_13 = arith.constant 0 : index
    %c0_14 = arith.constant 0 : index
    %26 = vector.load %arg9[%c0_13, %c0_14] : memref<1x32xf32, #tpu.memory_space<vmem>>, vector<1x32xf32>
    tpu.vector_store %arg9[%c0_13, %c0_14], %25 {strides = array<i32>} : memref<1x32xf32, #tpu.memory_space<vmem>>, vector<1x32xf32>,
    %c0_15 = arith.constant 0 : index
    %c0_16 = arith.constant 0 : index
    %27 = vector.load %arg8[%c0_15, %c0_16] : memref<1x32xf32, #tpu.memory_space<vmem>>, vector<1x32xf32>
    tpu.vector_store %arg8[%c0_15, %c0_16], %15 {strides = array<i32>} : memref<1x32xf32, #tpu.memory_space<vmem>>, vector<1x32xf32>,
    %cst_17 = arith.constant dense<0.000000e+00> : vector<32x32xf32>
    %28 = tpu.matmul %11, %20, %cst_17 {dimension_numbers = #tpu.dot_dimension_numbers<[0], [0], [1], [1], [0, 1, 1, 1], [], []>} : vector<8x32xf32>, vector<8x32xf32>, vector<32x32xf32> -> vector<32x32xf32>
    %c0_18 = arith.constant 0 : index
    %c0_19 = arith.constant 0 : index
    %c0_20 = arith.constant 0 : index
    %29 = vector.load %arg7[%c0_18, %c0_19, %c0_20] : memref<1x32x32xf32, #tpu.memory_space<vmem>>, vector<1x32x32xf32>
    %30 = vector.shape_cast %29 : vector<1x32x32xf32> to vector<32x32xf32>
    %31 = vector.broadcast %17 : vector<1x32xf32> to vector<32x32xf32>
    %32 = arith.mulf %31, %30 : vector<32x32xf32>
    %33 = arith.addf %32, %28 : vector<32x32xf32>
    %c0_21 = arith.constant 0 : index
    %c0_22 = arith.constant 0 : index
    %c0_23 = arith.constant 0 : index
    %34 = vector.load %arg7[%c0_21, %c0_22, %c0_23] : memref<1x32x32xf32, #tpu.memory_space<vmem>>, vector<1x32x32xf32>
    %35 = vector.shape_cast %34 : vector<1x32x32xf32> to vector<32x32xf32>
    %36 = vector.shape_cast %33 : vector<32x32xf32> to vector<1x32x32xf32>
    tpu.vector_store %arg7[%c0_21, %c0_22, %c0_23], %36 {strides = array<i32>} : memref<1x32x32xf32, #tpu.memory_space<vmem>>, vector<1x32x32xf32>,
    %c1_i32 = arith.constant 1 : i32
    %37 = arith.cmpi eq, %arg1, %c1_i32 : i32
    %38 = arith.extui %37 : i1 to i32
    %c0_i32_24 = arith.constant 0 : i32
    %39 = arith.cmpi ne, %38, %c0_i32_24 : i32
    scf.if %39 {
      %c0_25 = arith.constant 0 : index
      %c0_26 = arith.constant 0 : index
      %40 = vector.load %arg9[%c0_25, %c0_26] : memref<1x32xf32, #tpu.memory_space<vmem>>, vector<1x32xf32>
      %cst_27 = arith.constant 1.000000e+00 : f32
      %41 = vector.broadcast %cst_27 : f32 to vector<1x32xf32>
      %42 = arith.divf %41, %40 : vector<1x32xf32>
      %c0_28 = arith.constant 0 : index
      %c0_29 = arith.constant 0 : index
      %c0_30 = arith.constant 0 : index
      %43 = vector.load %arg7[%c0_28, %c0_29, %c0_30] : memref<1x32x32xf32, #tpu.memory_space<vmem>>, vector<1x32x32xf32>
      %44 = vector.shape_cast %43 : vector<1x32x32xf32> to vector<32x32xf32>
      %45 = vector.broadcast %42 : vector<1x32xf32> to vector<32x32xf32>
      %46 = arith.mulf %44, %45 : vector<32x32xf32>
      %c0_31 = arith.constant 0 : index
      %c0_32 = arith.constant 0 : index
      %47 = vector.load %arg5[%c0_31, %c0_32] : memref<32x32xf32, #tpu.memory_space<vmem>>, vector<32x32xf32>
      %48 = arith.mulf %46, %47 : vector<32x32xf32>
      %c0_33 = arith.constant 0 : index
      %c0_34 = arith.constant 0 : index
      %c0_35 = arith.constant 0 : index
      %c0_36 = arith.constant 0 : index
      %49 = vector.load %arg6[%c0_33, %c0_34, %c0_35, %c0_36] : memref<1x1x32x32xf32, #tpu.memory_space<vmem>>, vector<1x1x32x32xf32>
      %50 = vector.shape_cast %49 : vector<1x1x32x32xf32> to vector<32x32xf32>
      %51 = vector.shape_cast %48 : vector<32x32xf32> to vector<1x1x32x32xf32>
      tpu.vector_store %arg6[%c0_33, %c0_34, %c0_35, %c0_36], %51 {strides = array<i32>} : memref<1x1x32x32xf32, #tpu.memory_space<vmem>>, vector<1x1x32x32xf32>,
    } else {
    }
    return
  }
  func.func @transform_0(%arg0: i32, %arg1: i32) -> (i32, i32, i32) {
    %c0_i32 = arith.constant 0 : i32
    %c0_i32_0 = arith.constant 0 : i32
    return %arg0, %arg1, %c0_i32 : i32, i32, i32
  }
  func.func @transform_1(%arg0: i32, %arg1: i32) -> (i32, i32) {
    %c0_i32 = arith.constant 0 : i32
    %c0_i32_0 = arith.constant 0 : i32
    %c0_i32_1 = arith.constant 0 : i32
    return %c0_i32, %c0_i32_0 : i32, i32
  }
  func.func @transform_2(%arg0: i32, %arg1: i32) -> (i32, i32) {
    %c0_i32 = arith.constant 0 : i32
    %c0_i32_0 = arith.constant 0 : i32
    %c0_i32_1 = arith.constant 0 : i32
    return %c0_i32, %c0_i32_0 : i32, i32
  }
  func.func @transform_3(%arg0: i32, %arg1: i32) -> (i32, i32) {
    %c0_i32 = arith.constant 0 : i32
    %c0_i32_0 = arith.constant 0 : i32
    %c0_i32_1 = arith.constant 0 : i32
    return %c0_i32, %c0_i32_0 : i32, i32
  }
  func.func @transform_4(%arg0: i32, %arg1: i32) -> (i32, i32, i32, i32) {
    %c0_i32 = arith.constant 0 : i32
    %c0_i32_0 = arith.constant 0 : i32
    %c0_i32_1 = arith.constant 0 : i32
    %c0_i32_2 = arith.constant 0 : i32
    return %arg0, %c0_i32, %c0_i32_0, %c0_i32_1 : i32, i32, i32, i32
  }
}

</mosaic_0001>

<bundles_post_ra>
// kernel: tpu_custom_call.1
= control target key start
LH: loop header
LB: loop body
LE: loop exit
PB: predicated region body
PF: predicated region fallthrough
CT: control target
= control target key end

     0   :  { %6 = vsyncpa [#allocation3], 0  ;;  %s341_s0 = inlined_call_operand.hbm [shape: f32[8,128], index: 0, kind: input, shape index: {}]   ;;  %s342_s1 = inlined_call_operand.hbm [shape: f32[8,128], index: 1, kind: output, shape index: {}]  }
   0x1   :  { %7 = vsyncpa [#allocation4], 0  ;;  %s262_s6 = smov 0  }
   0x2 LB: > { %s145_s7 = sadd.s32 4294967295, %s248_s6   ;;  %p146_p0 = scmp.ge.s32.totalorder %s248_s6, 1  ;;  %s248_s6 = sphi %s262_s6, %s13_s6  }
   0x3   : > { %p60_p1 = scmp.lt.s32.totalorder %s248_s6, 3  ;;  %p276_p3 = scmp.eq.s32.totalorder %s145_s7, 0 }
   0x4   : > { %s250_s10 = smov [#allocation2]   ;;  %s180_s15 = scalar_lea.hbm %s341_s0, 128 }
   0x5   : > { %p270_p2 = pnand %p146_p0, %p60_p1  ;;  %s73_s11 = sshll.u32 %s250_s10, 4  ;;  %s74_s11 = int_to_ptr.vmem [resolvable:$true] %s73_s11 }
   0x6   : > { %s347_s9 = scalar_select %p276_p3, 1, 0 }
   0x7   : > { %s346_s8 = scalar_select %p270_p2, 1, 0 }
   0x8   : > { %p162_p4 = pneg %p270_p2  ;;  %p181_p6 = scmp.ne.s32.totalorder %s341_s0, %s180_s15 }
   0x9   : > { %p187_p10 = scmp.lt.u32.totalorder %s180_s15, %s341_s0 }
   0xa   : > { %p284_p5 = pnand %p276_p3, %p162_p4 }
   0xc   : > { %p182_p7 = pneg %p284_p5 }
   0xe   : > { %p183_p8 = pnand %p182_p7, %p181_p6 }
  0x10   : > { %p184_p9 = pneg %p183_p8 }
  0x12   : > { %p189_p11 = pnand %p187_p10, %p184_p9 }
  0x14   : > { %192 = shalt.err (!%p189_p11)
}
  0x15   : > { %s193_s20 = scalar_lea.vmem %s74_s11, 128  ;;  %p201_p1 = scmp.lt.s32.totalorder %s74_s11, %s74_s11 }
  0x16   : > { %p194_p12 = scmp.ne.s32.totalorder %s74_s11, %s193_s20  ;;  %p202_p4 = scmp.lt.s32.totalorder %s193_s20, %s193_s20 }
  0x18   : > { %p196_p13 = pnand %p194_p12, %p182_p7  ;;  %p203_p3 = por %p202_p4, %p201_p1 }
  0x1a   : > { %p197_p0 = pneg %p196_p13 }
  0x1c   : > { %p204_p2 = pnand %p203_p3, %p197_p0 }
  0x1e   : > { %207 = shalt.err (!%p204_p2)
}
  0x1f   : > { %165 = dma.hbm_to_vmem [thread:$0]  (!%p284_p5), %s341_s0, 128, %s74_s11, [#allocation3]  }
  0x20   : > { %p349_p6 = scmp.ne.s32.totalorder %s346_s8, 0 }
  0x21   : > { %p350_p8 = scmp.ne.s32.totalorder (!%p349_p6), %s347_s9, 0 }
  0x22   : > { %86 = sbr.rel (%p349_p6) target bundleno = 67 (0x43), region = 24 }
  0x29   : > { %239 = dma.done.wait (%p350_p8), [#allocation3], 128  }
  0x2a   : > { %241 = vsyncadd (%p350_p8), [#allocation3], 4294967168  ;;  %s251_s23 = smov [#allocation5]   ;;  %v96_v0 = vld [vmem:[#allocation2] sm:$0xff]  ;;  %p312_p2 = scmp.eq.s32.totalorder %s145_s7, 1 }
  0x2b   : > { %s106_s24 = sshll.u32 %s251_s23, 4  ;;  %v97_v1 = vmul.f32 2.0, %v96_v0  ;;  %s107_s24 = int_to_ptr.vmem [resolvable:$true] %s106_s24 }
  0x2c   : > { %s208_s26 = scalar_lea.vmem %s107_s24, 128  ;;  %p215_p9 = scmp.lt.s32.totalorder %s107_s24, %s107_s24 }
  0x2d   : > { %98 = vst [vmem:[#allocation5] sm:$0xff] %v97_v1  ;;  %p209_p3 = scmp.ne.s32.totalorder %s107_s24, %s208_s26  ;;  %p216_p10 = scmp.lt.s32.totalorder %s208_s26, %s208_s26 }
  0x2f   : > { %p210_p5 = pnand %p209_p3, %p312_p2  ;;  %p217_p11 = por %p216_p10, %p215_p9 }
  0x31   : > { %p211_p7 = pneg %p210_p5 }
  0x33   : > { %p218_p12 = pnand %p217_p11, %p211_p7 }
  0x35   : > { %221 = shalt.err (!%p218_p12)
}
  0x36   : > { %s222_s29 = scalar_lea.hbm %s342_s1, 128 }
  0x37   : > { %p223_p13 = scmp.ne.s32.totalorder %s342_s1, %s222_s29  ;;  %p228_p4 = scmp.lt.u32.totalorder %s222_s29, %s342_s1 }
  0x39   : > { %p224_p0 = pnand %p223_p13, %p312_p2 }
  0x3b   : > { %p225_p1 = pneg %p224_p0 }
  0x3d   : > { %p230_p6 = pnand %p228_p4, %p225_p1 }
  0x3f   : > { %233 = shalt.err (!%p230_p6)
}
  0x40   : > { %159 = dma.vmem_to_hbm [thread:$0]  (%p312_p2), %s107_s24, 128, %s342_s1, [#allocation4]  }
  0x41   : > { %243 = dma.done.wait (%p312_p2), [#allocation4], 128  }
  0x42   : > { %245 = vsyncadd (%p312_p2), [#allocation4], 4294967168 }
  0x43 PF: > { %s13_s6 = sadd.s32 1, %s248_s6  }
  0x44   : > { %p10_p8 = scmp.ge.s32.totalorder %s13_s6, 4  }
  0x46   :  { %12 = sbr.rel (!%p10_p8) target bundleno = 2 (0x2), region = 53 }
  0x4d   :  { %119 = vsyncpa [#allocation3], 1 }
  0x4e   :  { %121 = vsyncpa [#allocation3 + $0x1], 1 }
  0x4f   :  { %122 = vsyncpa [#allocation4], 1 }
  0x50   :  { %124 = vsyncpa [#allocation4 + $0x1], 1 }

// kernel: tpu_custom_call.1
= control target key start
LH: loop header
LB: loop body
LE: loop exit
PB: predicated region body
PF: predicated region fallthrough
CT: control target
= control target key end

     0   :  { %s1479_s0 = inlined_call_operand.hbm [shape: f32[2,16,32], index: 0, kind: input, shape index: {}]   ;;  %s1480_s1 = inlined_call_operand.hbm [shape: f32[32,64], index: 1, kind: input, shape index: {}]   ;;  %s1481_s2 = inlined_call_operand.vmem [shape: f32[1,64], index: 2, kind: input, shape index: {}]   ;;  %s1482_s3 = inlined_call_operand.hbm [shape: f32[32,32], index: 3, kind: input, shape index: {}]   ;;  %s1483_s4 = inlined_call_operand.hbm [shape: f32[2,1,32,32], index: 4, kind: output, shape index: {}]  }
   0x1   :  { %1495 = sst [smem:[#allocation20_spill]] %s1480_s1 }
   0x2   :  { %1496 = sst [smem:[#allocation21_spill]] %s1481_s2 }
   0x3   :  { %1497 = sst [smem:[#allocation22_spill]] %s1482_s3 }
   0x4   :  { %1498 = sst [smem:[#allocation23_spill]] %s1483_s4 }
   0x5   :  { %9 = vsyncpa [#allocation6], 0 }
   0x6   :  { %11 = vsyncpa [#allocation6 + $0x1], 0 }
   0x7   :  { %12 = vsyncpa [#allocation9], 0 }
   0x8   :  { %13 = vsyncpa [#allocation7], 0 }
   0x9   :  { %15 = vsyncpa [#allocation7 + $0x1], 0  ;;  %s1153_s15 = smov 0   ;;  %s1155_s16 = smov 0  }
   0xa   :  { %s1157_s17 = smov 0   ;;  %s1159_s18 = smov 0  }
   0xb   :  { %s1161_s19 = smov 0   ;;  %s1163_s20 = smov 0  }
   0xc   :  { %s1165_s21 = smov 0   ;;  %s1167_s22 = smov 0  }
   0xd   :  { %s1169_s23 = smov 0   ;;  %s1171_s24 = smov 0  }
   0xe   :  { %s1173_s25 = smov 0  }
   0xf LB: > { %1499 = sst [smem:[#allocation15_spill]] %s1072_s15  ;;  %s698_s26 = sadd.s32 4294967295, %s1112_s25   ;;  %s1112_s25 = sphi %s1173_s25, %s21_s25   ;;  %s1108_s24 = sphi %s1171_s24, %s1535_s24   ;;  %s1104_s23 = sphi %s1169_s23, %s1534_s23   ;;  %s1100_s22 = sphi %s1167_s22, %s1533_s22   ;;  %s1096_s21 = sphi %s1165_s21, %s1532_s21   ;;  %s1092_s20 = sphi %s1163_s20, %s1531_s20   ;;  %s1088_s19 = sphi %s1161_s19, %s1530_s19   ;;  %s1084_s18 = sphi %s1159_s18, %s1529_s18   ;;  %s1080_s17 = sphi %s1157_s17, %s1528_s17   ;;  %s1076_s16 = sphi %s1155_s16, %s1527_s16   ;;  %s1072_s15 = sphi %s1153_s15, %s1526_s15  }
  0x10   : > { %1500 = sst [smem:[#allocation16_spill]] %s1100_s22  ;;  %s699_s27 = sadd.s32 4294967294, %s1112_s25  }
  0x11   : > { %p55_p0 = scmp.ne.s32.totalorder %s1088_s19, %s1084_s18  ;;  %p1209_p1 = scmp.eq.s32.totalorder %s698_s26, 0 }
  0x12   : > { %p141_p2 = scmp.ne.s32.totalorder %s1080_s17, %s1076_s16  ;;  %p142_p3 = scmp.eq.s32.totalorder %s698_s26, 3 }
  0x13   : > { %s1501_s28 = scalar_select %p1209_p1, 1, 0 }
  0x14   : > { %p1217_p4 = por %p1209_p1, %p55_p0  ;;  %p147_p5 = scmp.ne.s32.totalorder %s1076_s16, %s1072_s15 }
  0x15   : > { %p1223_p6 = por %p142_p3, %p141_p2  ;;  %p148_p7 = scmp.eq.s32.totalorder %s699_s27, 3 }
  0x16   : > { %s1502_s29 = scalar_select %p1217_p4, 1, 0 }
  0x17   : > { %s1503_s30 = scalar_select %p1223_p6, 1, 0 }
  0x18   : > { %p700_p8 = scmp.ge.s32.totalorder %s1112_s25, 1  ;;  %p155_p9 = scmp.lt.s32.totalorder %s1112_s25, 5 }
  0x19   : > { %1504 = sst [smem:[#allocation17_spill]] %s1503_s30  ;;  %p1229_p10 = por %p148_p7, %p147_p5 }
  0x1a   : > { %p1233_p11 = pnand %p700_p8, %p155_p9  ;;  %s1114_s7 = smov [#allocation8]  }
  0x1b   : > { %s1505_s5 = scalar_select %p1229_p10, 1, 0 }
  0x1c   : > { %s1507_s6 = scalar_select %p1233_p11, 1, 0 }
  0x1d   : > { %1506 = sst [smem:[#allocation18_spill]] %s1505_s5  ;;  %s167_s8 = sshll.u32 %s1114_s7, 4  ;;  %s168_s8 = int_to_ptr.vmem [resolvable:$true] %s167_s8 }
  0x1e   : > { %p773_p12 = pneg %p1233_p11  ;;  %s1115_s10 = smov [#allocation10]  }
  0x1f   : > { %s183_s11 = sshll.u32 %s1115_s10, 4  ;;  %s1509_s1 = sld [smem:[#allocation20_spill]]  ;;  %s1245_s11 = int_to_ptr.vmem [resolvable:$true] %s183_s11 }
  0x20   : > { %p1241_p13 = pnand %p773_p12, %p1209_p1 }
  0x22   : > { %p902_p2 = pneg %p1241_p13 }
  0x25   : > { %s900_s14 = scalar_lea.hbm %s1509_s1, 512 }
  0x26   : > { %p901_p0 = scmp.ne.s32.totalorder %s1509_s1, %s900_s14  ;;  %p907_p7 = scmp.lt.u32.totalorder %s900_s14, %s1509_s1 }
  0x28   : > { %p903_p3 = pnand %p902_p2, %p901_p0 }
  0x2a   : > { %p904_p5 = pneg %p903_p3 }
  0x2c   : > { %p909_p8 = pnand %p907_p7, %p904_p5 }
  0x2e   : > { %912 = shalt.err (!%p909_p8)
}
  0x2f   : > { %s913_s10 = scalar_lea.vmem %s168_s8, 512  ;;  %p921_p6 = scmp.lt.s32.totalorder %s168_s8, %s168_s8 }
  0x30   : > { %p914_p9 = scmp.ne.s32.totalorder %s168_s8, %s913_s10  ;;  %p922_p1 = scmp.lt.s32.totalorder %s913_s10, %s913_s10 }
  0x32   : > { %p916_p12 = pnand %p914_p9, %p902_p2  ;;  %p923_p4 = por %p922_p1, %p921_p6 }
  0x34   : > { %p917_p10 = pneg %p916_p12 }
  0x36   : > { %p924_p11 = pnand %p923_p4, %p917_p10 }
  0x38   : > { %927 = shalt.err (!%p924_p11)
}
  0x39   : > { %s1116_s12 = smov 128   ;;  %s1117_s13 = smov 8  }
  0x3a   : > { %776 = dma.hbm_to_vmem [thread:$0]  (!%p1241_p13), %s1509_s1, 512, %s168_s8, [#allocation9], %s1116_s12, %s1116_s12, %s1117_s13  }
  0x3b   : > { %s1510_s3 = sld [smem:[#allocation22_spill]] }
  0x41   : > { %s928_s7 = scalar_lea.hbm %s1510_s3, 512 }
  0x42   : > { %p929_p0 = scmp.ne.s32.totalorder %s1510_s3, %s928_s7  ;;  %p935_p6 = scmp.lt.u32.totalorder %s928_s7, %s1510_s3 }
  0x44   : > { %p931_p1 = pnand %p929_p0, %p902_p2 }
  0x46   : > { %p932_p4 = pneg %p931_p1 }
  0x48   : > { %p937_p10 = pnand %p935_p6, %p932_p4 }
  0x4a   : > { %940 = shalt.err (!%p937_p10)
}
  0x4b   : > { %s941_s8 = scalar_lea.vmem %s1245_s11, 512  ;;  %p949_p7 = scmp.lt.s32.totalorder %s1245_s11, %s1245_s11 }
  0x4c   : > { %p942_p11 = scmp.ne.s32.totalorder %s1245_s11, %s941_s8  ;;  %p950_p8 = scmp.lt.s32.totalorder %s941_s8, %s941_s8 }
  0x4e   : > { %p944_p3 = pnand %p942_p11, %p902_p2  ;;  %p951_p9 = por %p950_p8, %p949_p7 }
  0x50   : > { %p945_p5 = pneg %p944_p3 }
  0x52   : > { %p952_p12 = pnand %p951_p9, %p945_p5 }
  0x54   : > { %955 = shalt.err (!%p952_p12)
}
  0x55   : > { %779 = dma.hbm_to_vmem [thread:$0]  (!%p1241_p13), %s1510_s3, 512, %s1245_s11, [#allocation9], %s1116_s12, %s1116_s12, %s1117_s13  }
  0x56   : > { %s30_s5 = sadd.s32 1, %s1104_s23  ;;  %s33_s9 = sadd.s32 1, %s1108_s24 }
  0x57   : > { %p31_p2 = scmp.ge.s32.totalorder %s30_s5, 2  ;;  %p49_p0 = scmp.ne.s32.totalorder %s1092_s20, %s1088_s19 }
  0x58   : > { %s42_s14 = sadd.s32 1, %s1092_s20  ;;  %p50_p1 = scmp.eq.s32.totalorder %s1112_s25, 0 }
  0x59   : > { %s1537_s5 = smov (%p31_p2, %s30_s5), 0  ;;  %s1539_s9 = smov (!%p31_p2, %s33_s9), %s1108_s24 }
  0x5a   : > { %1511 = sst [smem:[#allocation19_spill]] %s1537_s5  ;;  %p35_p4 = scmp.ge.s32.totalorder %s1539_s9, 2 }
  0x5b   : > { %s38_s18 = ssub.s32 %s1104_s23, %s1537_s5  ;;  %p1305_p6 = por %p50_p1, %p49_p0 }
  0x5c   : > { %s131_s11 = sadd.s32 1, %s1080_s17  ;;  %s1541_s9 = smov (%p35_p4, %s1539_s9), 0 }
  0x5d   : > { %p790_p13 = scmp.lt.s32.totalorder %s1112_s25, 4  ;;  %s197_s12 = sand.u32 1, %s1092_s20  }
  0x5e   : > { %s37_s13 = ssub.s32 %s1108_s24, %s1541_s9  ;;  %s705_s27 = sshll.u32 %s1108_s24, 1 }
  0x5f   : > { %s39_s7 = sor.u32 %s38_s18, %s37_s13  ;;  %p129_p10 = scmp.eq.s32.totalorder %s37_s13, 0 }
  0x60   : > { %p40_p11 = scmp.eq.s32.totalorder %s39_s7, 0  ;;  %s704_s10 = sshll.u32 %s197_s12, 3 }
  0x61   : > { %s1318_s8 = scalar_select %p129_p10, %s1080_s17, %s131_s11  }
  0x62   : > { %s1321_s4 = scalar_select %p40_p11, %s1092_s20, %s42_s14  }
  0x63   : > { %s206_s15 = sadd.s32 %s1104_s23, %s705_s27  ;;  %s201_s3 = scalar_lea.vmem [#allocation5], %s704_s10 }
  0x64   : > { %s706_s1 = sshll.u32 %s206_s15, 7  ;;  %s210_s5 = sshll.u32 %s201_s3, 4  ;;  %s1329_s5 = int_to_ptr.vmem [resolvable:$true] %s210_s5 }
  0x65   : > { %s1327_s2 = scalar_lea.hbm %s1479_s0, %s706_s1  ;;  %p1335_p3 = pnand %p790_p13, %p1305_p6 }
  0x66   : > { %s198_s3 = scalar_lea.sflag [#allocation6], %s197_s12  ;;  %s956_s18 = scalar_lea.hbm %s1327_s2, 128 }
  0x67   : > { %p957_p5 = scmp.ne.s32.totalorder %s1327_s2, %s956_s18  ;;  %p958_p7 = pneg %p1335_p3 }
  0x68   : > { %s961_s30 = scalar_lea.hbm %s1479_s0, 512  ;;  %p962_p12 = scmp.lt.u32.totalorder %s1327_s2, %s1479_s0 }
  0x69   : > { %p959_p8 = pnand %p958_p7, %p957_p5  ;;  %p963_p2 = scmp.lt.u32.totalorder %s961_s30, %s956_s18 }
  0x6a   : > { %p965_p1 = scmp.lt.u32.totalorder %s956_s18, %s1327_s2 }
  0x6b   : > { %p960_p9 = pneg %p959_p8  ;;  %p964_p0 = por %p963_p2, %p962_p12 }
  0x6d   : > { %p966_p4 = por %p965_p1, %p964_p0 }
  0x6f   : > { %p967_p6 = pnand %p966_p4, %p960_p9 }
  0x71   : > { %970 = shalt.err (!%p967_p6)
}
  0x72   : > { %s971_s12 = scalar_lea.vmem %s1329_s5, 128  ;;  %s1118_s13 = smov [#allocation5]  }
  0x73   : > { %p972_p13 = scmp.ne.s32.totalorder %s1329_s5, %s971_s12  ;;  %s976_s27 = sshll.u32 %s1118_s13, 4  ;;  %s977_s27 = int_to_ptr.vmem [resolvable:$false] %s976_s27 }
  0x74   : > { %s978_s7 = scalar_lea.vmem %s977_s27, 256  ;;  %p979_p5 = scmp.lt.s32.totalorder %s1329_s5, %s977_s27 }
  0x75   : > { %p974_p10 = pnand %p972_p13, %p958_p7  ;;  %p980_p8 = scmp.lt.s32.totalorder %s978_s7, %s971_s12 }
  0x77   : > { %p975_p11 = pneg %p974_p10  ;;  %p981_p12 = por %p980_p8, %p979_p5 }
  0x79   : > { %p982_p2 = pnand %p981_p12, %p975_p11 }
  0x7b   : > { %985 = shalt.err (!%p982_p2)
}
  0x7c   : > { %783 = dma.hbm_to_vmem [thread:$0]  (!%p1335_p3), %s1327_s2, 128, %s1329_s5, %s198_s3  }
  0x7d   : > { %p1514_p9 = scmp.ne.s32.totalorder %s1507_s6, 0 }
  0x7e   : > { %s221_s10 = sand.u32 (!%p1514_p9), 1, %s1088_s19   ;;  %p1515_p7 = scmp.ne.s32.totalorder (!%p1514_p9), %s1502_s29, 0 }
  0x7f   : > { %219 = sbr.rel (%p1514_p9) target bundleno = 883 (0x373), region = 36  ;;  %s708_s15 = sshll.u32 (!%p1514_p9), %s221_s10, 3 }
  0x80   : > { %s222_s18 = scalar_lea.sflag (!%p1514_p9), [#allocation6], %s221_s10  ;;  %s225_s1 = scalar_lea.vmem (!%p1514_p9), [#allocation5], %s708_s15 }
  0x86   : > { %1059 = dma.done.wait (%p1515_p7), %s222_s18, 128  }
  0x87   : > { %1061 = vsyncadd (%p1515_p7), %s222_s18, 4294967168  ;;  %p1516_p0 = scmp.ne.s32.totalorder %s1501_s28, 0 }
  0x89   : > { %1063 = dma.done.wait (%p1516_p0), [#allocation9], 1024  }
  0x8a   : > { %1065 = vsyncadd (%p1516_p0), [#allocation9], 4294966272  ;;  %s255_s2 = sand.u32 1, %s1076_s16   ;;  %v258_v0 = vld [vmem:[%s225_s1] sm:$0xff]  ;;  %p712_p3 = scmp.ne.s32.totalorder %s1096_s21, 0 }
  0x8b   : > { %s711_s6 = sshll.u32 %s255_s2, 5  ;;  %vm263_vm0 = vcmask (!%p712_p3), 253952   ;;  %vm266_vm1 = vcmask (!%p712_p3), 261120   ;;  %v1119_v1 = vmov (!%p712_p3), -inf   ;;  %v1120_v2 = vmov (!%p712_p3), 0.0  }
  0x8c   : > { %s1378_s5 = scalar_lea.vmem [#allocation11], %s711_s6  ;;  %262 = sbr.rel (%p712_p3) target bundleno = 147 (0x93), region = 52  ;;  %264 = vst.msk [vmem:[#allocation3] sm:$0x1] (!%p712_p3), %vm263_vm0, %v1119_v1  ;;  %265 = vst.msk [vmem:[#allocation4] sm:$0x1] (!%p712_p3), %vm263_vm0, %v1120_v2 }
  0x8d   : > { %267 = vst.msk [vmem:[#allocation2] sm:$0xff] (!%p712_p3), %vm266_vm1, %v1120_v2  ;;  %268 = vst.msk [vmem:[#allocation2 + $0x8] sm:$0xff] (!%p712_p3), %vm266_vm1, %v1120_v2 }
  0x8e   : > { %269 = vst.msk [vmem:[#allocation2 + $0x10] sm:$0xff] (!%p712_p3), %vm266_vm1, %v1120_v2  ;;  %270 = vst.msk [vmem:[#allocation2 + $0x18] sm:$0xff] (!%p712_p3), %vm266_vm1, %v1120_v2 }
  0x93 PF: > { %v271_v3 = vld [vmem:[#allocation8] sm:$0xff]  ;;  %v272_v4 = vld [vmem:[#allocation8 + $0x8] sm:$0xff]  ;;  %v273_v5 = vld [vmem:[#allocation8 + $0x10] sm:$0xff]  ;;  %v1121_v6 = vmov 0.0|0.0   ;;  %vm1122_vm2 = vmmov 0   ;;  %v1123_v9 = vmov 0.0   ;;  %v369_v18 = vlaneseq }
  0x94   : > { %755 = vmatprep.subr.bf16.mxu0 %v1121_v6  ;;  %v756_v7 = vpack.c.bf16 %v272_v4, %v271_v3  ;;  %v274_v8 = vld [vmem:[#allocation8 + $0x18] sm:$0xff]  ;;  %744 = vmatprep.mubr.msk.f32.mxu0 %vm1122_vm2, %v1123_v9  ;;  %vm282_vm3 = vcmask 261120   ;;  %s1517_s14 = sld [smem:[#allocation21_spill]]  ;;  %s1124_s3 = smov 96   ;;  %v356_v23 = vld [vmem:[#allocation3] sm:$0x1] }
  0x95   : > { %v759_v10 = vpack.c.bf16 %v274_v8, %v273_v5  ;;  %v370_v21 = vshrl.u32 %v369_v18, 7  ;;  %vm387_vm4 = vcmask 253952   ;;  %v377_v40 = vld [vmem:[#allocation4] sm:$0x1]  ;;  %vm426_vm5 = vcmask 64512   ;;  %v525_v50 = vld [vmem:[#allocation2 + $0x8] sm:$0xff] }
  0x96   : > { %757 = vmatpush3.bf16.msra.mxu0 %v756_v7  ;;  %v524_v51 = vld [vmem:[#allocation2] sm:$0xff]  ;;  %v527_v58 = vld [vmem:[#allocation2 + $0x18] sm:$0xff]  ;;  %v526_v59 = vld [vmem:[#allocation2 + $0x10] sm:$0xff]  ;;  %p719_p1 = scmp.ne.s32.totalorder %s1096_s21, 1 }
  0x97   : > { %758 = vmatprep.subr.bf16.mxu0 %v1121_v6  ;;  %v1386_v25 = vsub.s32 0, %v370_v21  ;;  %v567_v9 = vld [vmem:[#allocation10] sm:$0xff] (!%p719_p1) }
  0x9a   : > { %760 = vmatpush3.bf16.msra.mxu0 %v759_v10  ;;  %v713_v11 = vld [vmem:[%s1517_s14] ss:$0 sm:$0xff] }
  0x9b   : > { %v568_v10 = vld [vmem:[#allocation10 + $0x8] sm:$0xff] (!%p719_p1) }
  0x9d   : > { %745 = vmatmul.mubr.msk.f32.vlgmr.msra.gmra.mrb[0].mxu0 %vm282_vm3, %v258_v0 }
 0x170   : > { %v352_v12 = vpop.f32.mrb[0].mxu0 }
 0x171   : > { %v353_v13 = vadd.f32 %v713_v11, %v352_v12  ;;  %v746_v14 = vpop.f32.mrb[1].mxu0  ;;  %v569_v11 = vld [vmem:[#allocation10 + $0x10] sm:$0xff] (!%p719_p1)  ;;  %v570_v12 = vld [vmem:[#allocation10 + $0x18] sm:$0xff] (!%p719_p1) }
 0x173   : > { %v357_v15 = vsel %vm282_vm3, %v353_v13, -inf  ;;  %391 = vrot.lane.b32.xlu0 %v353_v13, %s1124_s3 }
 0x174   : > { %v358_v16 = vrot.slane %v357_v15, 4 }
 0x176   : > { %v359_v17 = vmax.f32 %v357_v15, %v358_v16 }
 0x178   : > { %v360_v19 = vrot.slane %v359_v17, 2 }
 0x17a   : > { %v361_v20 = vmax.f32 %v359_v17, %v360_v19 }
 0x17c   : > { %v362_v22 = vrot.slane %v361_v20, 1 }
 0x17e   : > { %v363_v24 = vmax.f32 %v361_v20, %v362_v22 }
 0x180   : > { %v364_v26 = vmax.f32 %v356_v23, %v363_v24 }
 0x182   : > { %v365_v27 = vsub.f32 %v356_v23, %v364_v26  ;;  %v372_v28 = vrot.slane %v364_v26, %v1386_v25  ;;  %389 = vst.msk [vmem:[#allocation3] sm:$0x1] %vm387_vm4, %v364_v26 }
 0x184   : > { %v366_v29 = vmul.f32 1.442695, %v365_v27  ;;  %v374_v30 = vsub.f32 %v353_v13, %v372_v28 }
 0x186   : > { %894 = vpow2.f32 %v366_v29  ;;  %v375_v31 = vmul.f32 1.442695, %v374_v30 }
 0x188   : > { %896 = vpow2.f32 %v375_v31 }
 0x190   : > { %v895_v32 = vpop.eup %894 }
 0x191   : > { %v532_v33 = vrot.slane %v895_v32, %v1386_v25  ;;  %v378_v42 = vmul.f32 %v895_v32, %v377_v40 }
 0x192   : > { %v897_v34 = vpop.eup %896 }
 0x193   : > { %v379_v35 = vsel %vm282_vm3, %v897_v34, 0.0  ;;  %747 = vmatprep.subr.mxu1 %v897_v34  ;;  %v535_v52 = vmul.f32 %v532_v33, %v525_v50  ;;  %v534_v54 = vmul.f32 %v532_v33, %v524_v51  ;;  %v537_v60 = vmul.f32 %v532_v33, %v527_v58 }
 0x194   : > { %v380_v36 = vrot.slane %v379_v35, 4  ;;  %748 = vmatpush3.msra.mxu1 %v897_v34  ;;  %v536_v62 = vmul.f32 %v532_v33, %v526_v59 }
 0x196   : > { %v381_v37 = vadd.f32 %v380_v36, %v379_v35 }
 0x198   : > { %v382_v38 = vrot.slane %v381_v37, 2 }
 0x19a   : > { %v383_v39 = vadd.f32 %v382_v38, %v381_v37 }
 0x19c   : > { %v384_v41 = vrot.slane %v383_v39, 1 }
 0x19e   : > { %v385_v43 = vadd.f32 %v384_v41, %v383_v39 }
 0x1a0   : > { %v386_v44 = vadd.f32 %v385_v43, %v378_v42 }
 0x1a2   : > { %388 = vst.msk [vmem:[#allocation4] sm:$0x1] %vm387_vm4, %v386_v44 }
 0x1a9   : > { %v550_v2 = vld [vmem:[#allocation4] sm:$0x1] (!%p719_p1) }
 0x1aa   : > { %898 = vrcp.f32 (!%p719_p1), %v550_v2 }
 0x1b4   : > { %v899_v4 = vpop.eup (!%p719_p1), %898 }
 0x1b5   : > { %v561_v8 = vrot.slane (!%p719_p1), %v899_v4, %v1386_v25 }
 0x1e5   : > { %v392_v45 = vpop.permute.xlu0 %391 }
 0x1e6   : > { %394 = vxpose.xlu0.b32.start.end [1/1] (short) (narrow) %v392_v45, 32 }
 0x266   : > { %v410_v46 = vpop.trf.xlu0 }
 0x267   : > { %749 = vmatprep.mubr.msk.f32.mxu1 %vm426_vm5, %v410_v46 }
 0x26a   : > { %v411_v47 = vpop.trf.xlu0 }
 0x26b   : > { %750 = vmatmul.mubr.msk.f32.vlgmr.msra.gmra.mrb[0].mxu1 %vm426_vm5, %v411_v47 }
 0x26e   : > { %v412_v48 = vpop.trf.xlu0 }
 0x26f   : > { %752 = vmatprep.mubr.msk.f32.mxu1 %vm426_vm5, %v412_v48 }
 0x272   : > { %v413_v49 = vpop.trf.xlu0 }
 0x273   : > { %753 = vmatmul.mubr.msk.f32.gmra.mrb[2].mxu1 %vm426_vm5, %v413_v49 }
 0x33e   : > { %v751_v53 = vpop.f32.mrb[0].mxu1 }
 0x33f   : > { %v539_v55 = vadd.f32 %v751_v53, %v535_v52  ;;  %v505_v56 = vpop.f32.mrb[1].mxu1 }
 0x340   : > { %v538_v57 = vadd.f32 %v534_v54, %v505_v56 }
 0x341   : > { %543 = vst.msk [vmem:[#allocation2 + $0x8] sm:$0xff] %vm282_vm3, %v539_v55 }
 0x342   : > { %542 = vst.msk [vmem:[#allocation2] sm:$0xff] %vm282_vm3, %v538_v57 }
 0x344   : > { %549 = sbr.rel (%p719_p1) target bundleno = 855 (0x357), region = 56 }
 0x346   : > { %v754_v61 = vpop.f32.mrb[2].mxu1 }
 0x347   : > { %v541_v63 = vadd.f32 %v754_v61, %v537_v60  ;;  %v515_v0 = vpop.f32.mrb[3].mxu1 }
 0x348   : > { %v540_v1 = vadd.f32 %v536_v62, %v515_v0  ;;  %v554_v5 = vld [vmem:[#allocation2 + $0x8] sm:$0xff] (!%p719_p1) }
 0x349   : > { %545 = vst.msk [vmem:[#allocation2 + $0x18] sm:$0xff] %vm282_vm3, %v541_v63  ;;  %v553_v3 = vld [vmem:[#allocation2] sm:$0xff] (!%p719_p1)  ;;  %v564_v14 = vmul.f32 (!%p719_p1), %v561_v8, %v554_v5 }
 0x34a   : > { %544 = vst.msk [vmem:[#allocation2 + $0x10] sm:$0xff] %vm282_vm3, %v540_v1  ;;  %v563_v13 = vmul.f32 (!%p719_p1), %v561_v8, %v553_v3 }
 0x34b   : > { %v572_v18 = vmul.f32 %v568_v10, %v564_v14 }
 0x34c   : > { %v571_v17 = vmul.f32 %v567_v9, %v563_v13 }
 0x34d   : > { %576 = vst.msk [vmem:[%s1378_s5 + $0x8] sm:$0xff] %vm282_vm3, %v572_v18 }
 0x34e   : > { %575 = vst.msk [vmem:[%s1378_s5] sm:$0xff] %vm282_vm3, %v571_v17 }
 0x350   : > { %v556_v7 = vld [vmem:[#allocation2 + $0x18] sm:$0xff] }
 0x351   : > { %v555_v6 = vld [vmem:[#allocation2 + $0x10] sm:$0xff]  ;;  %v566_v16 = vmul.f32 %v561_v8, %v556_v7 }
 0x352   : > { %v565_v15 = vmul.f32 %v561_v8, %v555_v6 }
 0x353   : > { %v574_v20 = vmul.f32 %v570_v12, %v566_v16 }
 0x354   : > { %v573_v19 = vmul.f32 %v569_v11, %v565_v15 }
 0x355   : > { %578 = vst.msk [vmem:[%s1378_s5 + $0x18] sm:$0xff] %vm282_vm3, %v574_v20 }
 0x356   : > { %577 = vst.msk [vmem:[%s1378_s5 + $0x10] sm:$0xff] %vm282_vm3, %v573_v19 }
 0x357 PF: > { %s1518_s21 = sld [smem:[#allocation16_spill]]  ;;  %s1519_s22 = sld [smem:[#allocation17_spill]] }
 0x358   : > { %s1520_s12 = sld [smem:[#allocation23_spill]]  ;;  %s593_s27 = sshll.u32 %s1378_s5, 4  ;;  %s1414_s27 = int_to_ptr.vmem [resolvable:$true] %s593_s27 }
 0x359   : > { %s1418_s7 = scalar_lea.sflag [#allocation7], %s255_s2  ;;  %s986_s10 = scalar_lea.vmem %s1414_s27, 512 }
 0x35a   : > { %p987_p4 = scmp.ne.s32.totalorder %s1414_s27, %s986_s10  ;;  %s1125_s15 = smov [#allocation11]  }
 0x35b   : > { %s990_s18 = sshll.u32 %s1125_s15, 4  ;;  %s991_s18 = int_to_ptr.vmem [resolvable:$false] %s990_s18 }
 0x35c   : > { %s992_s1 = scalar_lea.vmem %s991_s18, 1024  ;;  %p993_p11 = scmp.lt.s32.totalorder %s1414_s27, %s991_s18 }
 0x35d   : > { %s725_s30 = sshll.u32 %s1518_s21, 9  ;;  %p1521_p6 = scmp.ne.s32.totalorder %s1519_s22, 0 }
 0x35e   : > { %s1411_s13 = scalar_lea.hbm %s1520_s12, %s725_s30  ;;  %p994_p5 = scmp.lt.s32.totalorder %s992_s1, %s986_s10 }
 0x35f   : > { %p988_p13 = pnand %p987_p4, %p1521_p6 }
 0x360   : > { %p995_p8 = por %p994_p5, %p993_p11 }
 0x361   : > { %p989_p10 = pneg %p988_p13 }
 0x363   : > { %p996_p12 = pnand %p995_p8, %p989_p10 }
 0x365   : > { %999 = shalt.err (!%p996_p12)
}
 0x366   : > { %s1000_s2 = scalar_lea.hbm %s1411_s13, 512  ;;  %s1004_s28 = scalar_lea.hbm %s1520_s12, 1024 }
 0x367   : > { %p1001_p2 = scmp.ne.s32.totalorder %s1411_s13, %s1000_s2  ;;  %p1005_p0 = scmp.lt.u32.totalorder %s1411_s13, %s1520_s12 }
 0x368   : > { %p1006_p3 = scmp.lt.u32.totalorder %s1004_s28, %s1000_s2  ;;  %p1008_p4 = scmp.lt.u32.totalorder %s1000_s2, %s1411_s13 }
 0x369   : > { %p1002_p9 = pnand %p1001_p2, %p1521_p6 }
 0x36a   : > { %p1007_p1 = por %p1006_p3, %p1005_p0 }
 0x36b   : > { %p1003_p7 = pneg %p1002_p9 }
 0x36c   : > { %p1009_p13 = por %p1008_p4, %p1007_p1 }
 0x36e   : > { %p1010_p10 = pnand %p1009_p13, %p1003_p7 }
 0x370   : > { %1013 = shalt.err (!%p1010_p10)
}
 0x371   : > { %s1126_s3 = smov 128   ;;  %s1127_s21 = smov 8  }
 0x372   : > { %771 = dma.vmem_to_hbm [thread:$0]  (%p1521_p6), %s1414_s27, 512, %s1411_s13, %s1418_s7, %s1126_s3, %s1126_s3, %s1127_s21  }
 0x373 PF: > { %s1522_s30 = sld [smem:[#allocation15_spill]]  ;;  %s1523_s26 = sld [smem:[#allocation18_spill]] }
 0x374   : > { %p793_p11 = scmp.ge.s32.totalorder %s1112_s25, 2 }
 0x379   : > { %s608_s11 = sand.u32 1, %s1522_s30   ;;  %p1524_p5 = scmp.ne.s32.totalorder %s1523_s26, 0 }
 0x37a   : > { %s609_s10 = scalar_lea.sflag [#allocation7], %s608_s11 }
 0x37b   : > { %p785_p8 = pnand %p793_p11, %p1524_p5 }
 0x37d   : > { %1067 = dma.done.wait (!%p785_p8), %s609_s10, 512  }
 0x37e   : > { %1069 = vsyncadd (!%p785_p8), %s609_s10, 4294966784  ;;  %s21_s25 = sadd.s32 1, %s1112_s25   ;;  %s1525_s13 = sld [smem:[#allocation19_spill]] }
 0x37f   : > { %p18_p12 = scmp.ge.s32.totalorder %s21_s25, 6   ;;  %s1526_s15 = smov %s1076_s16 }
 0x380   : > { %s1527_s16 = smov %s1080_s17  ;;  %s1528_s17 = smov %s1318_s8 }
 0x381   : > { %s1529_s18 = smov %s1088_s19  ;;  %s1530_s19 = smov %s1092_s20 }
 0x382   : > { %s1531_s20 = smov %s1321_s4  ;;  %s1532_s21 = smov %s1104_s23 }
 0x383   : > { %s1533_s22 = smov %s1108_s24  ;;  %s1535_s24 = smov %s1541_s9 }
 0x384   : > { %s1534_s23 = smov %s1525_s13  ;;  %20 = sbr.rel (!%p18_p12) target bundleno = 15 (0xf), region = 97 }
 0x38b   :  { %614 = vsyncpa [#allocation6], 1 }
 0x38c   :  { %616 = vsyncpa [#allocation6 + $0x1], 1 }
 0x38d   :  { %617 = vsyncpa [#allocation9], 1 }
 0x38e   :  { %618 = vsyncpa [#allocation7], 1 }
 0x38f   :  { %620 = vsyncpa [#allocation7 + $0x1], 1 }

</bundles_post_ra>
